<compile_context>
chip_gen: v7x
topology: tpu7x:2x2x1
jax: 0.10.0
libtpu: 0.0.40
codegen_flags: <defaults>
</compile_context>

<pallas_src>
import functools

import jax
import jax.numpy as jnp
from jax.experimental import pallas as pl
from jax.experimental.pallas import tpu as pltpu


def _round_up(a, b):
    return ((a + b - 1) // b) * b


def _largest_divisor_tile(total, unit, target):
    """Largest multiple of `unit` that divides `total` and is <= max(target, unit)."""
    best = unit
    cand = unit
    limit = max(unit, (target // unit) * unit)
    while cand <= limit:
        if total % cand == 0:
            best = cand
        cand += unit
    return best


def _default_vmem_limit_bytes():
    # ~70% of physical VMEM: ~90 MiB on v5e/v6e (128 MiB), ~45 MiB on v7x (64 MiB).
    try:
        info = pltpu.get_tpu_info()
        cap = getattr(info, "vmem_capacity_bytes", None)
        if cap:
            return int(min(0.7 * cap, 100 * 1024 * 1024))
    except Exception:
        pass
    return 48 * 1024 * 1024  # conservative fallback, safe on every generation


# ----------------------------------------------------------------------------------
# Fused path: one kernel, x streamed from HBM exactly once per row group.
# Internally chunked over lane stripes so no full-slab f32 temporary is ever live.
# ----------------------------------------------------------------------------------
def _fused_kernel(x_ref, w1t_ref, w2_ref, o_ref, sum_ref, y_ref, *,
                  inv_hw, chunk, n_full, rem):
    # x_ref:   (RB, HW)   input slab (RB = d * C rows of the (N*C, HW) layout)
    # w1t_ref: (RB, M)    block-diagonal folded conv1 weights, M = d * C_mid
    # w2_ref:  (RB, M)    block-diagonal folded conv2 weights
    # o_ref:   (RB, HW)
    # sum_ref: (RB, 1) f32 scratch  |  y_ref: (RB, 1) f32 scratch

    # ---- pass A: per-row spatial sum, stripe by stripe (no full-slab f32 temp) ----
    sum_ref[...] = jnp.zeros_like(sum_ref)
    if n_full > 0:
        @pl.loop(0, n_full)
        def _(i):
            off = pl.multiple_of(i * chunk, 128)
            xs = x_ref[:, pl.ds(off, chunk)].astype(jnp.float32)
            sum_ref[...] += jnp.sum(xs, axis=1, keepdims=True)
    if rem > 0:  # static ragged tail (HW % chunk), masked loads on the last vreg tile
        xs = x_ref[:, pl.ds(n_full * chunk, rem)].astype(jnp.float32)
        sum_ref[...] += jnp.sum(xs, axis=1, keepdims=True)

    # ---- tiny channel MLP on VPU/XLU (block-diagonal fold; MXU deliberately idle) ----
    mean = sum_ref[...] * inv_hw                                     # (RB, 1)
    h = jnp.sum(w1t_ref[...] * mean, axis=0, keepdims=True)          # (1, M)
    h = jnp.maximum(h, 0.0)                                          # ReLU
    y_ref[...] = jax.nn.sigmoid(jnp.sum(w2_ref[...] * h, axis=1, keepdims=True))

    # ---- pass B: rescale stripe by stripe, store back in the narrow dtype ----
    if n_full > 0:
        @pl.loop(0, n_full)
        def _(i):
            off = pl.multiple_of(i * chunk, 128)
            xs = x_ref[:, pl.ds(off, chunk)].astype(jnp.float32)
            o_ref[:, pl.ds(off, chunk)] = (xs * y_ref[...]).astype(o_ref.dtype)
    if rem > 0:
        off = n_full * chunk
        xs = x_ref[:, pl.ds(off, rem)].astype(jnp.float32)
        o_ref[:, pl.ds(off, rem)] = (xs * y_ref[...]).astype(o_ref.dtype)


# ----------------------------------------------------------------------------------
# Tiled path, pass 1: per-row (per batch*channel) spatial sum.
# grid = (row_tiles, hw_tiles); hw axis last and "arbitrary" (reduction); the output
# block index ignores it -> accumulator stays resident in VMEM across the reduction.
# ----------------------------------------------------------------------------------
def _pool_sum_kernel(x_ref, sum_ref):
    @pl.when(pl.program_id(1) == 0)
    def _():
        sum_ref[...] = jnp.zeros_like(sum_ref)

    sum_ref[...] += jnp.sum(x_ref[...].astype(jnp.float32), axis=1, keepdims=True)


# ----------------------------------------------------------------------------------
# Tiled path, pass 3: elementwise rescale x * y with lane-dense 128-multiple tiles.
# Both grid axes independent -> "parallel" (megacore / 2-TC v7x sharding).
# ----------------------------------------------------------------------------------
def _scale_kernel(x_ref, y_ref, o_ref, *, narrow_math):
    x = x_ref[...]
    y = y_ref[...]
    if narrow_math:
        # bf16 multiply (v6e/v7x have bf16 VALU; v5e widens internally — still correct).
        o_ref[...] = x * y.astype(x.dtype)
    else:
        o_ref[...] = (x.astype(jnp.float32) * y).astype(o_ref.dtype)


def channel_attention(x_nchw, w1, w2, *, lane_tile=2048, fused_chunk=2048,
                      force_tiled=False, vmem_limit_bytes=None):
    """SE-style channel attention.

    x_nchw: (N, C, H, W)
    w1:     (C_mid, C_in)  weights of the first 1x1 conv (bias=False)
    w2:     (C_out, C_mid) weights of the second 1x1 conv (bias=False)
    Returns an array of the same shape and dtype as x_nchw.
    """
    N, C, H, W = x_nchw.shape
    C_mid, C_in = w1.shape
    C_out, C_mid2 = w2.shape
    assert C_in == C and C_out == C and C_mid2 == C_mid, \
        "x * y broadcast requires C_out == C_in == C"

    HW = H * W
    R = N * C
    orig_dtype = x_nchw.dtype
    itemsize = jnp.dtype(orig_dtype).itemsize
    sub = 8 * max(1, 4 // itemsize)          # sublane packing: 8 f32, 16 bf16, 32 int8

    if vmem_limit_bytes is None:
        vmem_limit_bytes = _default_vmem_limit_bytes()
    vmem_limit_bytes = int(vmem_limit_bytes)

    # (N, C, H, W) -> (N*C, HW): contiguous reshape, no data movement. batch*channel on
    # sublanes, flattened spatial on lanes.
    x2d = x_nchw.reshape(R, HW)

    # --------------------------- fused-path row grouping --------------------------
    # Smallest batch fold d (d | N) making the sublane block a multiple of the packing;
    # smallest d => longest grid => best pipelining and both v7x cores busy when N > d.
    d = None
    for cand in range(1, N + 1):
        if N % cand == 0 and (cand * C) % sub == 0:
            d = cand
            break
    if d is None:
        d = N                                 # RB == R: full-extent sublane block, always legal
    RB = d * C
    grid_len = N // d
    M = d * C_mid

    chunk = min(_round_up(HW, 128), max(128, _round_up(int(fused_chunk), 128)))
    n_full = HW // chunk
    rem = HW - n_full * chunk

    RB_est = _round_up(RB, sub)
    HW_est = _round_up(HW, 128)
    fused_need = (
        4 * RB_est * HW_est * itemsize        # double-buffered input + output blocks
        + 4 * RB_est * chunk * 4              # per-stripe f32 temporaries (headroom)
        + 2 * RB_est * _round_up(M, 128) * 4  # folded weight blocks
        + 2 * RB_est * 128 * 4                # (RB,1) f32 scratches, lane-padded
    )
    fused_ok = (not force_tiled) and fused_need <= int(0.8 * vmem_limit_bytes)

    if fused_ok:
        # ------------------------------ FUSED PATH -------------------------------
        # No wrapper pad / slice: lane block = full HW extent (legal even if ragged).
        w1f = jnp.asarray(w1, jnp.float32)                 # (C_mid, C)
        w2f = jnp.asarray(w2, jnp.float32)                 # (C, C_mid)
        eye = jnp.eye(d, dtype=jnp.float32)
        # W1t_blk[b*C + c, b'*C_mid + m] = (b == b') * w1[m, c]
        w1t_blk = (eye[:, None, :, None] * w1f.T[None, :, None, :]).reshape(RB, M)
        # W2_blk[b*C + c, b'*C_mid + m] = (b == b') * w2[c, m]
        w2_blk = (eye[:, None, :, None] * w2f[None, :, None, :]).reshape(RB, M)

        out2d = pl.pallas_call(
            functools.partial(_fused_kernel, inv_hw=1.0 / HW, chunk=chunk,
                              n_full=n_full, rem=rem),
            out_shape=jax.ShapeDtypeStruct((R, HW), orig_dtype),
            grid_spec=pltpu.PrefetchScalarGridSpec(
                num_scalar_prefetch=0,
                grid=(grid_len,),
                in_specs=[
                    pl.BlockSpec((RB, HW), lambda g: (g, 0)),
                    pl.BlockSpec((RB, M), lambda g: (0, 0)),
                    pl.BlockSpec((RB, M), lambda g: (0, 0)),
                ],
                out_specs=pl.BlockSpec((RB, HW), lambda g: (g, 0)),
                scratch_shapes=[pltpu.VMEM((RB, 1), jnp.float32),
                                pltpu.VMEM((RB, 1), jnp.float32)],
            ),
            compiler_params=pltpu.CompilerParams(
                dimension_semantics=("parallel",),
                vmem_limit_bytes=vmem_limit_bytes,
            ),
        )(x2d, w1t_blk, w2_blk)
        return out2d.reshape(N, C, H, W)

    # -------------------------------- TILED PATH ---------------------------------
    lane_target = max(128, _round_up(int(lane_tile), 128))
    HWp = _round_up(HW, 128)                  # lanes padded only to 128, never to T
    T = _largest_divisor_tile(HWp, 128, lane_target)

    R_pad = _round_up(R, sub)                 # bounded row padding (< sub extra rows)
    target_block_bytes = 2 * 1024 * 1024      # ~2 MiB/block: v5e/v6e sweet spot, v7x-safe
    row_target = min(1024, max(sub, target_block_bytes // max(1, T * itemsize)))
    RB_t = _largest_divisor_tile(R_pad, sub, row_target)

    if R_pad != R or HWp != HW:
        # Single combined pad; one extra HBM round trip only for ragged shapes.
        x2d_p = jnp.pad(x2d, ((0, R_pad - R), (0, HWp - HW)))
    else:
        x2d_p = x2d

    grid = (R_pad // RB_t, HWp // T)

    # Pass 1: per-row spatial sums (accumulated in the resident output block).
    # NOTE: on v5e, pipeline_mode=pl.Buffered(3) on the input spec can help if the
    # trace shows exposed DMA; default double buffering is kept here.
    sums = pl.pallas_call(
        _pool_sum_kernel,
        out_shape=jax.ShapeDtypeStruct((R_pad, 1), jnp.float32),
        grid_spec=pltpu.PrefetchScalarGridSpec(
            num_scalar_prefetch=0,
            grid=grid,
            in_specs=[pl.BlockSpec((RB_t, T), lambda r, t: (r, t))],
            out_specs=pl.BlockSpec((RB_t, 1), lambda r, t: (r, 0)),
        ),
        compiler_params=pltpu.CompilerParams(
            dimension_semantics=("parallel", "arbitrary"),
            vmem_limit_bytes=vmem_limit_bytes,
        ),
    )(x2d_p)

    # Pass 2: tiny channel MLP once per batch (negligible; hoisted out of the hot loop).
    mean = (sums[:R, 0] / HW).reshape(N, C)
    h = jnp.maximum(mean @ jnp.asarray(w1, jnp.float32).T, 0.0)      # (N, C_mid)
    y = jax.nn.sigmoid(h @ jnp.asarray(w2, jnp.float32).T)           # (N, C)
    y2d = y.reshape(R, 1)
    if R_pad != R:
        y2d = jnp.pad(y2d, ((0, R_pad - R), (0, 0)))

    # Pass 3: elementwise rescale, fully parallel 2-D grid, lane-dense stores.
    narrow_math = jnp.dtype(orig_dtype) == jnp.dtype(jnp.bfloat16)
    out2d = pl.pallas_call(
        functools.partial(_scale_kernel, narrow_math=narrow_math),
        out_shape=jax.ShapeDtypeStruct((R_pad, HWp), orig_dtype),
        grid_spec=pltpu.PrefetchScalarGridSpec(
            num_scalar_prefetch=0,
            grid=grid,
            in_specs=[
                pl.BlockSpec((RB_t, T), lambda r, t: (r, t)),
                pl.BlockSpec((RB_t, 1), lambda r, t: (r, 0)),
            ],
            out_specs=pl.BlockSpec((RB_t, T), lambda r, t: (r, t)),
        ),
        compiler_params=pltpu.CompilerParams(
            dimension_semantics=("parallel", "parallel"),
            vmem_limit_bytes=vmem_limit_bytes,
        ),
    )(x2d_p, y2d)

    if R_pad != R or HWp != HW:
        out2d = out2d[:R, :HW]
    return out2d.reshape(N, C, H, W)


def _reference(x_nchw, w1, w2):
    # Pure-JAX reference matching the PyTorch module semantics (math in f32,
    # output in the input dtype). Both convs are bias=False per the module spec.
    xf = x_nchw.astype(jnp.float32)
    mean = jnp.mean(xf, axis=(2, 3))                                 # (N, C)
    h = jnp.maximum(mean @ jnp.asarray(w1, jnp.float32).T, 0.0)      # (N, C_mid)
    y = jax.nn.sigmoid(h @ jnp.asarray(w2, jnp.float32).T)           # (N, C)
    return (xf * y[:, :, None, None]).astype(x_nchw.dtype)


if __name__ == "__main__":
    # Module config: C_in = C_out = 4, reduction = 16 -> C_mid = max(1, 4 // 16) = 1
    N, C, H, W = 2, 4, 16, 16
    reduction = 16
    C_mid = max(1, C // reduction)

    key = jax.random.PRNGKey(0)
    kx, k1, k2 = jax.random.split(key, 3)

    x = jax.random.normal(kx, (N, C, H, W), dtype=jnp.float32)
    # conv1: (C_mid, C_in, 1, 1) -> (C_mid, C_in); conv2: (C_out, C_mid, 1, 1) -> (C_out, C_mid)
    w1 = jax.random.normal(k1, (C_mid, C), dtype=jnp.float32) * 0.5
    w2 = jax.random.normal(k2, (C, C_mid), dtype=jnp.float32) * 0.5

    # 1) Fused single-read kernel (aligned HW), f32.
    out = jax.block_until_ready(channel_attention(x, w1, w2))
    ref = _reference(x, w1, w2)
    assert out.shape == ref.shape and out.dtype == ref.dtype
    assert jnp.allclose(out, ref, atol=1e-5, rtol=1e-5), "fused path mismatch"

    # 2) Fused kernel with ragged HW (15*15 = 225, no wrapper pad; in-kernel tail
    #    stripe) and >= 2 grid steps (C=8 -> fold d=1, grid=(2,)).
    C3 = 8
    C_mid3 = max(1, C3 // reduction)
    kx3, k13, k23 = jax.random.split(jax.random.PRNGKey(1), 3)
    x3 = jax.random.normal(kx3, (2, C3, 15, 15), dtype=jnp.float32)
    w13 = jax.random.normal(k13, (C_mid3, C3), dtype=jnp.float32) * 0.5
    w23 = jax.random.normal(k23, (C3, C_mid3), dtype=jnp.float32) * 0.5
    out3 = jax.block_until_ready(channel_attention(x3, w13, w23))
    ref3 = _reference(x3, w13, w23)
    assert out3.shape == ref3.shape and out3.dtype == ref3.dtype
    assert jnp.allclose(out3, ref3, atol=1e-5, rtol=1e-5), "fused ragged path mismatch"

    # 3) Two-pass tiled (pool + scale) path, forced. Exercises bf16 storage dtype,
    #    odd spatial size (padded to 128-lane multiple) and bounded row padding.
    N2, C2, H2, W2 = 2, 4, 15, 15
    kx2, k12, k22 = jax.random.split(jax.random.PRNGKey(0), 3)
    x2 = jax.random.normal(kx2, (N2, C2, H2, W2), dtype=jnp.bfloat16)
    w1b = jax.random.normal(k12, (C_mid, C2), dtype=jnp.float32) * 0.5
    w2b = jax.random.normal(k22, (C2, C_mid), dtype=jnp.float32) * 0.5
    out2 = jax.block_until_ready(channel_attention(x2, w1b, w2b, force_tiled=True))
    ref2 = _reference(x2, w1b, w2b)
    assert out2.shape == ref2.shape and out2.dtype == ref2.dtype
    assert jnp.allclose(out2.astype(jnp.float32), ref2.astype(jnp.float32),
                        atol=2e-2, rtol=2e-2), "tiled path mismatch"

    print("KERNEL_OK")
</pallas_src>

<mosaic_0001>
module attributes {stable_mosaic.version = 11 : i64} {
  func.func @_fused_kernel(%arg0: i32, %arg1: memref<8x256xf32, #tpu.memory_space<vmem>>, %arg2: memref<8x2xf32, #tpu.memory_space<vmem>>, %arg3: memref<8x2xf32, #tpu.memory_space<vmem>>, %arg4: memref<8x256xf32, #tpu.memory_space<vmem>>, %arg5: memref<8x1xf32, #tpu.memory_space<vmem>>, %arg6: memref<8x1xf32, #tpu.memory_space<vmem>>) attributes {dimension_semantics = [#tpu.dimension_semantics<parallel>], iteration_bounds = array<i64: 1>, scalar_prefetch = 0 : i64, scratch_operands = 2 : i64, tpu.core_type = #tpu.core_type<tc>, window_params = [{transform_indices = @transform_0, window_bounds = array<i64: 8, 256>}, {pipeline_mode = #tpu.pipeline_mode<synchronous>, transform_indices = @transform_1, window_bounds = array<i64: 8, 2>}, {pipeline_mode = #tpu.pipeline_mode<synchronous>, transform_indices = @transform_2, window_bounds = array<i64: 8, 2>}, {transform_indices = @transform_3, window_bounds = array<i64: 8, 256>}]} {
    %cst = arith.constant 0.000000e+00 : f32
    %0 = vector.broadcast %cst : f32 to vector<8x1xf32>
    %c0 = arith.constant 0 : index
    %c0_0 = arith.constant 0 : index
    %1 = vector.load %arg5[%c0, %c0_0] : memref<8x1xf32, #tpu.memory_space<vmem>>, vector<8x1xf32>
    tpu.vector_store %arg5[%c0, %c0_0], %0 {strides = array<i32>} : memref<8x1xf32, #tpu.memory_space<vmem>>, vector<8x1xf32>,
    %c0_i32 = arith.constant 0 : i32
    %c1_i32 = arith.constant 1 : i32
    %2 = arith.muli %c0_i32, %c1_i32 : i32
    %c0_i32_1 = arith.constant 0 : i32
    %3 = arith.addi %c0_i32_1, %2 : i32
    %c256_i32 = arith.constant 256 : i32
    %4 = arith.muli %3, %c256_i32 : i32
    %5 = tpu.assume_multiple %4, 128 : i32
    %c0_2 = arith.constant 0 : index
    %6 = arith.index_cast %5 : i32 to index
    %7 = vector.load %arg1[%c0_2, %6] : memref<8x256xf32, #tpu.memory_space<vmem>>, vector<8x256xf32>
    %c0_3 = arith.constant 0 : index
    %c0_4 = arith.constant 0 : index
    %8 = vector.load %arg5[%c0_3, %c0_4] : memref<8x1xf32, #tpu.memory_space<vmem>>, vector<8x1xf32>
    %cst_5 = arith.constant dense<0.000000e+00> : vector<8xf32>
    %9 = vector.multi_reduction <add>, %7, %cst_5 [1] : vector<8x256xf32> to vector<8xf32>
    %10 = vector.shape_cast %9 : vector<8xf32> to vector<8x1xf32>
    %11 = arith.addf %8, %10 : vector<8x1xf32>
    %c0_6 = arith.constant 0 : index
    %c0_7 = arith.constant 0 : index
    %12 = vector.load %arg5[%c0_6, %c0_7] : memref<8x1xf32, #tpu.memory_space<vmem>>, vector<8x1xf32>
    tpu.vector_store %arg5[%c0_6, %c0_7], %11 {strides = array<i32>} : memref<8x1xf32, #tpu.memory_space<vmem>>, vector<8x1xf32>,
    %c1_i32_8 = arith.constant 1 : i32
    %c0_9 = arith.constant 0 : index
    %c0_10 = arith.constant 0 : index
    %13 = vector.load %arg5[%c0_9, %c0_10] : memref<8x1xf32, #tpu.memory_space<vmem>>, vector<8x1xf32>
    %cst_11 = arith.constant 3.906250e-03 : f32
    %14 = vector.broadcast %cst_11 : f32 to vector<8x1xf32>
    %15 = arith.mulf %13, %14 : vector<8x1xf32>
    %c0_12 = arith.constant 0 : index
    %c0_13 = arith.constant 0 : index
    %16 = vector.load %arg2[%c0_12, %c0_13] : memref<8x2xf32, #tpu.memory_space<vmem>>, vector<8x2xf32>
    %17 = vector.broadcast %15 : vector<8x1xf32> to vector<8x2xf32>
    %18 = arith.mulf %16, %17 : vector<8x2xf32>
    %cst_14 = arith.constant dense<0.000000e+00> : vector<2xf32>
    %19 = vector.multi_reduction <add>, %18, %cst_14 [0] : vector<8x2xf32> to vector<2xf32>
    %20 = vector.shape_cast %19 : vector<2xf32> to vector<1x2xf32>
    %cst_15 = arith.constant 0.000000e+00 : f32
    %21 = vector.broadcast %cst_15 : f32 to vector<1x2xf32>
    %22 = arith.maximumf %20, %21 : vector<1x2xf32>
    %c0_16 = arith.constant 0 : index
    %c0_17 = arith.constant 0 : index
    %23 = vector.load %arg3[%c0_16, %c0_17] : memref<8x2xf32, #tpu.memory_space<vmem>>, vector<8x2xf32>
    %24 = vector.broadcast %22 : vector<1x2xf32> to vector<8x2xf32>
    %25 = arith.mulf %23, %24 : vector<8x2xf32>
    %cst_18 = arith.constant dense<0.000000e+00> : vector<8xf32>
    %26 = vector.multi_reduction <add>, %25, %cst_18 [1] : vector<8x2xf32> to vector<8xf32>
    %27 = vector.shape_cast %26 : vector<8xf32> to vector<8x1xf32>
    %28 = arith.negf %27 : vector<8x1xf32>
    %29 = math.exp %28 : vector<8x1xf32>
    %cst_19 = arith.constant 1.000000e+00 : f32
    %30 = vector.broadcast %cst_19 : f32 to vector<8x1xf32>
    %31 = arith.addf %30, %29 : vector<8x1xf32>
    %32 = arith.divf %30, %31 : vector<8x1xf32>
    %c0_20 = arith.constant 0 : index
    %c0_21 = arith.constant 0 : index
    %33 = vector.load %arg6[%c0_20, %c0_21] : memref<8x1xf32, #tpu.memory_space<vmem>>, vector<8x1xf32>
    tpu.vector_store %arg6[%c0_20, %c0_21], %32 {strides = array<i32>} : memref<8x1xf32, #tpu.memory_space<vmem>>, vector<8x1xf32>,
    %c0_i32_22 = arith.constant 0 : i32
    %c1_i32_23 = arith.constant 1 : i32
    %34 = arith.muli %c0_i32_22, %c1_i32_23 : i32
    %c0_i32_24 = arith.constant 0 : i32
    %35 = arith.addi %c0_i32_24, %34 : i32
    %c256_i32_25 = arith.constant 256 : i32
    %36 = arith.muli %35, %c256_i32_25 : i32
    %37 = tpu.assume_multiple %36, 128 : i32
    %c0_26 = arith.constant 0 : index
    %38 = arith.index_cast %37 : i32 to index
    %39 = vector.load %arg1[%c0_26, %38] : memref<8x256xf32, #tpu.memory_space<vmem>>, vector<8x256xf32>
    %c0_27 = arith.constant 0 : index
    %c0_28 = arith.constant 0 : index
    %40 = vector.load %arg6[%c0_27, %c0_28] : memref<8x1xf32, #tpu.memory_space<vmem>>, vector<8x1xf32>
    %41 = vector.broadcast %40 : vector<8x1xf32> to vector<8x256xf32>
    %42 = arith.mulf %39, %41 : vector<8x256xf32>
    %c0_29 = arith.constant 0 : index
    %43 = arith.index_cast %37 : i32 to index
    %44 = vector.load %arg4[%c0_29, %43] : memref<8x256xf32, #tpu.memory_space<vmem>>, vector<8x256xf32>
    tpu.vector_store %arg4[%c0_29, %43], %42 {strides = array<i32>} : memref<8x256xf32, #tpu.memory_space<vmem>>, vector<8x256xf32>,
    %c1_i32_30 = arith.constant 1 : i32
    return
  }
  func.func @transform_0(%arg0: i32) -> (i32, i32) {
    %c0_i32 = arith.constant 0 : i32
    %c0_i32_0 = arith.constant 0 : i32
    return %arg0, %c0_i32 : i32, i32
  }
  func.func @transform_1(%arg0: i32) -> (i32, i32) {
    %c0_i32 = arith.constant 0 : i32
    %c0_i32_0 = arith.constant 0 : i32
    %c0_i32_1 = arith.constant 0 : i32
    return %c0_i32, %c0_i32_0 : i32, i32
  }
  func.func @transform_2(%arg0: i32) -> (i32, i32) {
    %c0_i32 = arith.constant 0 : i32
    %c0_i32_0 = arith.constant 0 : i32
    %c0_i32_1 = arith.constant 0 : i32
    return %c0_i32, %c0_i32_0 : i32, i32
  }
  func.func @transform_3(%arg0: i32) -> (i32, i32) {
    %c0_i32 = arith.constant 0 : i32
    %c0_i32_0 = arith.constant 0 : i32
    return %arg0, %c0_i32 : i32, i32
  }
}

</mosaic_0001>

<bundles_post_ra>
// kernel: tpu_custom_call.1
= control target key start
LH: loop header
LB: loop body
LE: loop exit
PB: predicated region body
PF: predicated region fallthrough
CT: control target
= control target key end

     0   :  { %s165_s0 = inlined_call_operand.vmem [shape: f32[8,256], index: 0, kind: input, shape index: {}]   ;;  %s166_s1 = inlined_call_operand.vmem [shape: f32[8,2], index: 1, kind: input, shape index: {}]   ;;  %s167_s2 = inlined_call_operand.vmem [shape: f32[8,2], index: 2, kind: input, shape index: {}]   ;;  %s168_s3 = inlined_call_operand.hbm [shape: f32[8,256], index: 3, kind: output, shape index: {}]  }
   0x1   :  { %v17_v0 = vld [vmem:[%s165_s0] sm:$0xff]  ;;  %v18_v1 = vld [vmem:[%s165_s0 + $0x8] sm:$0xff] }
   0x2   :  { %8 = vsyncpa [#allocation5], 0  ;;  %v20_v2 = vadd.f32 %v18_v1, %v17_v0  ;;  %vm15_vm0 = vcmask 7168   ;;  %v115_v3 = vmov 0.0   ;;  %v116_v4 = vmov 0   ;;  %v27_v10 = vld [vmem:[%s166_s1] sm:$0xff] }
   0x3   :  { %16 = vst.msk [vmem:[#allocation2] sm:$0xff] %vm15_vm0, %v115_v3  ;;  %85 = vset.pattern.permute.xlu0 %v116_v4  ;;  %86 = vset.pattern.permute.xlu1 %v116_v4  ;;  %vm34_vm1 = vcmask 15360   ;;  %v43_v20 = vld [vmem:[%s167_s2] sm:$0xff]  ;;  %s117_s1 = smov [#allocation4]  }
   0x4   :  { %21 = vadd.xlane.f32.xlu0 %v20_v2  ;;  %s73_s19 = sshll.u32 %s117_s1, 4  ;;  %s74_s19 = int_to_ptr.vmem [resolvable:$true] %s73_s19 }
   0x5   :  { %s91_s2 = scalar_lea.vmem %s74_s19, 256  ;;  %p96_p1 = scmp.lt.s32.totalorder %s74_s19, %s74_s19 }
   0x6   :  { %p92_p0 = scmp.ne.s32.totalorder %s74_s19, %s91_s2  ;;  %p97_p2 = scmp.lt.s32.totalorder %s91_s2, %s91_s2 }
   0x8   :  { %p98_p3 = por %p97_p2, %p96_p1 }
   0xa   :  { %v19_v5 = vld [vmem:[#allocation2] sm:$0xff]  ;;  %p99_p4 = pnand %p98_p3, %p92_p0 }
  0x91   :  { %v22_v6 = vpop.xlane.xlu0 %21 }
  0x92   :  { %v23_v7 = vadd.f32 %v22_v6, %v19_v5 }
  0x94   :  { %24 = vst.msk [vmem:[#allocation2] sm:$0xff] %vm15_vm0, %v23_v7 }
  0x9b   :  { %v25_v8 = vld [vmem:[#allocation2] sm:$0xff] }
  0x9c   :  { %v26_v9 = vmul.f32 0.00390625, %v25_v8 }
  0x9e   :  { %30 = vperm.xlu0 %85, %v26_v9  }
 0x11d   :  { %v31_v11 = vpop.permute.xlu0 %30 }
 0x11e   :  { %v33_v12 = vmul.f32 %v31_v11, %v27_v10 }
 0x120   :  { %v35_v13 = vsel %vm34_vm1, %v33_v12, 0.0 }
 0x121   :  { %v36_v14 = vrot.slane %v35_v13, 4 }
 0x123   :  { %v37_v15 = vadd.f32 %v36_v14, %v35_v13 }
 0x125   :  { %v38_v16 = vrot.slane %v37_v15, 2 }
 0x127   :  { %v39_v17 = vadd.f32 %v38_v16, %v37_v15 }
 0x129   :  { %v40_v18 = vrot.slane %v39_v17, 1 }
 0x12b   :  { %v41_v19 = vadd.f32 %v40_v18, %v39_v17 }
 0x12d   :  { %v42_v21 = vmax.f32 %v41_v19, 0.0 }
 0x12f   :  { %v44_v22 = vmul.f32 %v43_v20, %v42_v21 }
 0x131   :  { %v45_v23 = vsel %vm34_vm1, %v44_v22, 0.0 }
 0x132   :  { %46 = vadd.xlane.f32.xlu1 %v45_v23 }
 0x1bf   :  { %v47_v24 = vpop.xlane.xlu1 %46 }
 0x1c0   :  { %v81_v25 = vmul.f32 -1.442695, %v47_v24 }
 0x1c2   :  { %87 = vpow2.f32 %v81_v25 }
 0x1cc   :  { %v88_v26 = vpop.eup %87 }
 0x1cd   :  { %v51_v27 = vadd.f32 1.0, %v88_v26 }
 0x1cf   :  { %89 = vrcp.f32 %v51_v27 }
 0x1d9   :  { %v90_v28 = vpop.eup %89 }
 0x1da   :  { %54 = vst.msk [vmem:[#allocation3] sm:$0xff] %vm15_vm0, %v90_v28 }
 0x1e1   :  { %v57_v29 = vld [vmem:[#allocation3] sm:$0xff] }
 0x1e2   :  { %60 = vperm.xlu1 %86, %v57_v29  }
 0x261   :  { %v61_v30 = vpop.permute.xlu1 %60 }
 0x262   :  { %v63_v31 = vmul.f32 %v61_v30, %v17_v0  ;;  %v64_v32 = vmul.f32 %v61_v30, %v18_v1 }
 0x264   :  { %65 = vst [vmem:[#allocation4] sm:$0xff] %v63_v31  ;;  %66 = vst [vmem:[#allocation4 + $0x8] sm:$0xff] %v64_v32 }
 0x265   :  { %102 = shalt.err (!%p99_p4)
}
 0x266   :  { %s103_s22 = scalar_lea.hbm %s168_s3, 256 }
 0x267   :  { %p104_p5 = scmp.ne.s32.totalorder %s168_s3, %s103_s22  ;;  %p107_p6 = scmp.lt.u32.totalorder %s103_s22, %s168_s3 }
 0x269   :  { %p109_p7 = pnand %p107_p6, %p104_p5 }
 0x26b   :  { %112 = shalt.err (!%p109_p7)
}
 0x26c   :  { %76 = dma.vmem_to_hbm [thread:$0]  %s74_s19, 256, %s168_s3, [#allocation5]  }
 0x26d   :  { %113 = dma.done.wait [#allocation5], 256  }
 0x26e   :  { %114 = vsyncadd [#allocation5], 4294967040 }
 0x26f   :  { %80 = vsyncpa [#allocation5], 1 }

</bundles_post_ra>
